<compile_context>
chip_gen: v7x
topology: tpu7x:2x2x1
jax: 0.10.0
libtpu: 0.0.40
codegen_flags: <defaults>
</compile_context>

<pallas_src>
import jax
import jax.numpy as jnp
from jax.experimental import pallas as pl
from jax.experimental.pallas import tpu as pltpu


def _round_up(n, m):
    return (n + m - 1) // m * m


def prenet_kernel(x_ref, w1_ref, b1_ref, w2_ref, b2_ref, o_ref):
    # x_ref:  (TB, D_in)   bf16      w1_ref: (D_in, H)   bf16
    # b1_ref: (1, H)       f32       w2_ref: (H, D_out)  bf16
    # b2_ref: (1, D_out)   f32       o_ref:  (TB, D_out) f32
    h = jnp.dot(x_ref[...], w1_ref[...], preferred_element_type=jnp.float32)
    h = jnp.maximum(h + b1_ref[...], 0.0)          # bias + ReLU in f32 (VPU)

    # TODO(synk): Dropout(0.5) is implemented as identity (eval-mode). Torch's
    # RNG stream cannot be reproduced bit-exactly; a distributionally-correct
    # in-kernel dropout would use pltpu.prng_seed / prng_random_bits + 2x scale.

    y = jnp.dot(h.astype(jnp.bfloat16), w2_ref[...],
                preferred_element_type=jnp.float32)
    y = jnp.maximum(y + b2_ref[...], 0.0)
    o_ref[...] = y.astype(o_ref.dtype)


def prenet(x, w1, b1, w2, b2, *, tb=256):
    """x: (B, D_in) f32.  w1: (D_in, H), w2: (H, D_out).  Returns (B, D_out) f32."""
    B, D_in = x.shape
    H = w1.shape[1]
    D_out = w2.shape[1]

    # --- tile sizing -------------------------------------------------------
    SUB = 16  # bf16 sublane packing
    tb_eff = min(tb, _round_up(B, SUB))
    # Prefer >= 2 grid steps (v7x has 2 TensorCores) when the batch allows.
    if _round_up(B, tb_eff) // tb_eff < 2 and tb_eff > SUB:
        tb_eff = _round_up(tb_eff // 2, SUB)
    B_pad = _round_up(B, tb_eff)
    grid = (B_pad // tb_eff,)

    # --- operand preparation (bf16 matmul operands, f32 biases) ------------
    x_bf = x.astype(jnp.bfloat16)
    if B_pad != B:
        x_bf = jnp.pad(x_bf, ((0, B_pad - B), (0, 0)))
    w1_bf = w1.astype(jnp.bfloat16)
    w2_bf = w2.astype(jnp.bfloat16)
    b1_f = b1.astype(jnp.float32).reshape(1, H)
    b2_f = b2.astype(jnp.float32).reshape(1, D_out)

    # --- cost estimate (helps XLA overlap this small kernel) ---------------
    cost = pl.CostEstimate(
        flops=2 * B_pad * (D_in * H + H * D_out),
        transcendentals=0,
        bytes_accessed=(B_pad * D_in * 2 + B_pad * D_out * 4
                        + (D_in * H + H * D_out) * 2 + (H + D_out) * 4),
    )

    # --- VMEM budget: only set an explicit limit if the default (32 MiB
    # scoped) would be exceeded (double-buffered activation tiles + weights).
    vmem_needed = (2 * tb_eff * D_in * 2          # bf16 input tiles (x2 buf)
                   + 2 * tb_eff * D_out * 4       # f32 output tiles (x2 buf)
                   + 2 * ((D_in * H + H * D_out) * 2 + (H + D_out) * 4)
                   + (2 << 20))                   # headroom
    vmem_limit = min(vmem_needed, 96 << 20) if vmem_needed > (32 << 20) else None

    out_pad = pl.pallas_call(
        prenet_kernel,
        out_shape=jax.ShapeDtypeStruct((B_pad, D_out), jnp.float32),
        grid_spec=pltpu.PrefetchScalarGridSpec(
            num_scalar_prefetch=0,
            grid=grid,
            in_specs=[
                pl.BlockSpec((tb_eff, D_in), lambda i: (i, 0)),  # batch-tiled x
                # Constant index_map -> weights/biases resident in VMEM across
                # the whole grid (no per-step re-DMA).
                pl.BlockSpec((D_in, H), lambda i: (0, 0)),       # W1
                pl.BlockSpec((1, H), lambda i: (0, 0)),          # b1
                pl.BlockSpec((H, D_out), lambda i: (0, 0)),      # W2
                pl.BlockSpec((1, D_out), lambda i: (0, 0)),      # b2
            ],
            out_specs=pl.BlockSpec((tb_eff, D_out), lambda i: (i, 0)),
        ),
        compiler_params=pltpu.CompilerParams(
            dimension_semantics=("parallel",),
            vmem_limit_bytes=vmem_limit,
        ),
        cost_estimate=cost,
    )(x_bf, w1_bf, b1_f, w2_bf, b2_f)

    return out_pad[:B]


def _init_linear(key, fan_in, fan_out):
    """PyTorch nn.Linear default init: U(-1/sqrt(fan_in), 1/sqrt(fan_in))."""
    kw, kb = jax.random.split(key)
    bound = 1.0 / jnp.sqrt(fan_in)
    # PyTorch weight is (out, in); we store transposed (in, out) for x @ W.
    w = jax.random.uniform(kw, (fan_in, fan_out), jnp.float32, -bound, bound)
    b = jax.random.uniform(kb, (1, fan_out), jnp.float32, -bound, bound)
    return w, b


if __name__ == "__main__":
    input_size, hidden_size, output_size = 256, 256, 128
    batch = 8  # small demo batch (real workloads use batch*frames rows)

    root = jax.random.PRNGKey(0)
    kx, k1, k2 = jax.random.split(root, 3)

    x = jax.random.normal(kx, (batch, input_size), jnp.float32)
    w1, b1 = _init_linear(k1, input_size, hidden_size)
    w2, b2 = _init_linear(k2, hidden_size, output_size)

    out = prenet(x, w1, b1, w2, b2)
    out = jax.block_until_ready(out)
    assert out.shape == (batch, output_size)

    # Reference with the same bf16-rounded matmul operands (f32 accumulate).
    xr = x.astype(jnp.bfloat16).astype(jnp.float32)
    w1r = w1.astype(jnp.bfloat16).astype(jnp.float32)
    w2r = w2.astype(jnp.bfloat16).astype(jnp.float32)
    h_ref = jnp.maximum(xr @ w1r + b1, 0.0)
    ref = jnp.maximum(
        h_ref.astype(jnp.bfloat16).astype(jnp.float32) @ w2r + b2, 0.0)
    assert jnp.allclose(out, ref, atol=2e-2, rtol=2e-2), (
        float(jnp.max(jnp.abs(out - ref))))

    print("KERNEL_OK")
</pallas_src>

<mosaic_0001>
module attributes {stable_mosaic.version = 11 : i64} {
  func.func @prenet_kernel(%arg0: i32, %arg1: memref<16x256xbf16, #tpu.memory_space<vmem>>, %arg2: memref<256x256xbf16, #tpu.memory_space<vmem>>, %arg3: memref<1x256xf32, #tpu.memory_space<vmem>>, %arg4: memref<256x128xbf16, #tpu.memory_space<vmem>>, %arg5: memref<1x128xf32, #tpu.memory_space<vmem>>, %arg6: memref<16x128xf32, #tpu.memory_space<vmem>>) attributes {dimension_semantics = [#tpu.dimension_semantics<parallel>], iteration_bounds = array<i64: 1>, scalar_prefetch = 0 : i64, scratch_operands = 0 : i64, tpu.core_type = #tpu.core_type<tc>, window_params = [{transform_indices = @transform_0, window_bounds = array<i64: 16, 256>}, {pipeline_mode = #tpu.pipeline_mode<synchronous>, transform_indices = @transform_1, window_bounds = array<i64: 256, 256>}, {pipeline_mode = #tpu.pipeline_mode<synchronous>, transform_indices = @transform_2, window_bounds = array<i64: 1, 256>}, {pipeline_mode = #tpu.pipeline_mode<synchronous>, transform_indices = @transform_3, window_bounds = array<i64: 256, 128>}, {pipeline_mode = #tpu.pipeline_mode<synchronous>, transform_indices = @transform_4, window_bounds = array<i64: 1, 128>}, {transform_indices = @transform_5, window_bounds = array<i64: 16, 128>}]} {
    %c0 = arith.constant 0 : index
    %c0_0 = arith.constant 0 : index
    %0 = vector.load %arg1[%c0, %c0_0] : memref<16x256xbf16, #tpu.memory_space<vmem>>, vector<16x256xbf16>
    %c0_1 = arith.constant 0 : index
    %c0_2 = arith.constant 0 : index
    %1 = vector.load %arg2[%c0_1, %c0_2] : memref<256x256xbf16, #tpu.memory_space<vmem>>, vector<256x256xbf16>
    %cst = arith.constant dense<0.000000e+00> : vector<16x256xf32>
    %2 = tpu.matmul %0, %1, %cst {dimension_numbers = #tpu.dot_dimension_numbers<[1], [0], [0], [1], [0, 0, 1, 1], [], []>} : vector<16x256xbf16>, vector<256x256xbf16>, vector<16x256xf32> -> vector<16x256xf32>
    %c0_3 = arith.constant 0 : index
    %c0_4 = arith.constant 0 : index
    %3 = vector.load %arg3[%c0_3, %c0_4] : memref<1x256xf32, #tpu.memory_space<vmem>>, vector<1x256xf32>
    %4 = vector.broadcast %3 : vector<1x256xf32> to vector<16x256xf32>
    %5 = arith.addf %2, %4 : vector<16x256xf32>
    %cst_5 = arith.constant 0.000000e+00 : f32
    %6 = vector.broadcast %cst_5 : f32 to vector<16x256xf32>
    %7 = arith.maximumf %5, %6 : vector<16x256xf32>
    %8 = arith.truncf %7 : vector<16x256xf32> to vector<16x256xbf16>
    %c0_6 = arith.constant 0 : index
    %c0_7 = arith.constant 0 : index
    %9 = vector.load %arg4[%c0_6, %c0_7] : memref<256x128xbf16, #tpu.memory_space<vmem>>, vector<256x128xbf16>
    %cst_8 = arith.constant dense<0.000000e+00> : vector<16x128xf32>
    %10 = tpu.matmul %8, %9, %cst_8 {dimension_numbers = #tpu.dot_dimension_numbers<[1], [0], [0], [1], [0, 0, 1, 1], [], []>} : vector<16x256xbf16>, vector<256x128xbf16>, vector<16x128xf32> -> vector<16x128xf32>
    %c0_9 = arith.constant 0 : index
    %c0_10 = arith.constant 0 : index
    %11 = vector.load %arg5[%c0_9, %c0_10] : memref<1x128xf32, #tpu.memory_space<vmem>>, vector<1x128xf32>
    %12 = vector.broadcast %11 : vector<1x128xf32> to vector<16x128xf32>
    %13 = arith.addf %10, %12 : vector<16x128xf32>
    %cst_11 = arith.constant 0.000000e+00 : f32
    %14 = vector.broadcast %cst_11 : f32 to vector<16x128xf32>
    %15 = arith.maximumf %13, %14 : vector<16x128xf32>
    %c0_12 = arith.constant 0 : index
    %c0_13 = arith.constant 0 : index
    %16 = vector.load %arg6[%c0_12, %c0_13] : memref<16x128xf32, #tpu.memory_space<vmem>>, vector<16x128xf32>
    tpu.vector_store %arg6[%c0_12, %c0_13], %15 {strides = array<i32>} : memref<16x128xf32, #tpu.memory_space<vmem>>, vector<16x128xf32>,
    return
  }
  func.func @transform_0(%arg0: i32) -> (i32, i32) {
    %c0_i32 = arith.constant 0 : i32
    %c0_i32_0 = arith.constant 0 : i32
    return %arg0, %c0_i32 : i32, i32
  }
  func.func @transform_1(%arg0: i32) -> (i32, i32) {
    %c0_i32 = arith.constant 0 : i32
    %c0_i32_0 = arith.constant 0 : i32
    %c0_i32_1 = arith.constant 0 : i32
    return %c0_i32, %c0_i32_0 : i32, i32
  }
  func.func @transform_2(%arg0: i32) -> (i32, i32) {
    %c0_i32 = arith.constant 0 : i32
    %c0_i32_0 = arith.constant 0 : i32
    %c0_i32_1 = arith.constant 0 : i32
    return %c0_i32, %c0_i32_0 : i32, i32
  }
  func.func @transform_3(%arg0: i32) -> (i32, i32) {
    %c0_i32 = arith.constant 0 : i32
    %c0_i32_0 = arith.constant 0 : i32
    %c0_i32_1 = arith.constant 0 : i32
    return %c0_i32, %c0_i32_0 : i32, i32
  }
  func.func @transform_4(%arg0: i32) -> (i32, i32) {
    %c0_i32 = arith.constant 0 : i32
    %c0_i32_0 = arith.constant 0 : i32
    %c0_i32_1 = arith.constant 0 : i32
    return %c0_i32, %c0_i32_0 : i32, i32
  }
  func.func @transform_5(%arg0: i32) -> (i32, i32) {
    %c0_i32 = arith.constant 0 : i32
    %c0_i32_0 = arith.constant 0 : i32
    return %arg0, %c0_i32 : i32, i32
  }
}

</mosaic_0001>

<bundles_post_ra>
// kernel: tpu_custom_call.1
= control target key start
LH: loop header
LB: loop body
LE: loop exit
PB: predicated region body
PF: predicated region fallthrough
CT: control target
= control target key end

     0   :  { %10 = vsyncpa [#allocation3], 0  ;;  %s876_s0 = inlined_call_operand.hbm [shape: bf16[16,256], index: 0, kind: input, shape index: {}]   ;;  %s877_s1 = inlined_call_operand.hbm [shape: bf16[256,256], index: 1, kind: input, shape index: {}]   ;;  %s878_s2 = inlined_call_operand.vmem [shape: f32[1,256], index: 2, kind: input, shape index: {}]   ;;  %s879_s3 = inlined_call_operand.hbm [shape: bf16[256,128], index: 3, kind: input, shape index: {}]   ;;  %s880_s4 = inlined_call_operand.vmem [shape: f32[1,128], index: 4, kind: input, shape index: {}]   ;;  %s881_s5 = inlined_call_operand.hbm [shape: f32[16,128], index: 5, kind: output, shape index: {}]  }
   0x1   :  { %11 = vsyncpa [#allocation6], 0 }
   0x2   :  { %12 = vsyncpa [#allocation4], 0  ;;  %s768_s18 = smov [#allocation5]   ;;  %s769_s20 = smov [#allocation2]  }
   0x3   :  { %s30_s19 = sshll.u32 %s768_s18, 4  ;;  %s18_s21 = sshll.u32 %s769_s20, 4  ;;  %s31_s19 = int_to_ptr.vmem [resolvable:$true] %s30_s19  ;;  %s806_s21 = int_to_ptr.vmem [resolvable:$true] %s18_s21 }
   0x4   :  { %s674_s24 = scalar_lea.hbm %s877_s1, 4096 }
   0x5   :  { %p675_p0 = scmp.ne.s32.totalorder %s877_s1, %s674_s24  ;;  %p678_p1 = scmp.lt.u32.totalorder %s674_s24, %s877_s1 }
   0x7   :  { %p680_p2 = pnand %p678_p1, %p675_p0 }
   0x9   :  { %683 = shalt.err (!%p680_p2)
}
   0xa   :  { %s684_s29 = scalar_lea.vmem %s31_s19, 4096  ;;  %p689_p4 = scmp.lt.s32.totalorder %s31_s19, %s31_s19 }
   0xb   :  { %p685_p3 = scmp.ne.s32.totalorder %s31_s19, %s684_s29  ;;  %p690_p5 = scmp.lt.s32.totalorder %s684_s29, %s684_s29 }
   0xd   :  { %p691_p6 = por %p690_p5, %p689_p4 }
   0xf   :  { %p692_p7 = pnand %p691_p6, %p685_p3 }
  0x11   :  { %695 = shalt.err (!%p692_p7)
}
  0x12   :  { %s770_s30 = smov 128   ;;  %s771_s6 = smov 8  }
  0x13   :  { %36 = dma.hbm_to_vmem [thread:$0]  %s877_s1, 4096, %s31_s19, [#allocation6], %s770_s30, %s770_s30, %s771_s6  }
  0x14   :  { %s696_s11 = scalar_lea.hbm %s876_s0, 256 }
  0x15   :  { %p697_p8 = scmp.ne.s32.totalorder %s876_s0, %s696_s11  ;;  %p700_p9 = scmp.lt.u32.totalorder %s696_s11, %s876_s0 }
  0x17   :  { %p702_p10 = pnand %p700_p9, %p697_p8 }
  0x19   :  { %705 = shalt.err (!%p702_p10)
}
  0x1a   :  { %s706_s16 = scalar_lea.vmem %s806_s21, 256  ;;  %p711_p12 = scmp.lt.s32.totalorder %s806_s21, %s806_s21 }
  0x1b   :  { %p707_p11 = scmp.ne.s32.totalorder %s806_s21, %s706_s16  ;;  %p712_p13 = scmp.lt.s32.totalorder %s706_s16, %s706_s16 }
  0x1d   :  { %p713_p0 = por %p712_p13, %p711_p12 }
  0x1f   :  { %p714_p1 = pnand %p713_p0, %p707_p11 }
  0x21   :  { %717 = shalt.err (!%p714_p1)
}
  0x22   :  { %24 = dma.hbm_to_vmem [thread:$0]  %s876_s0, 256, %s806_s21, [#allocation3], %s770_s30, %s770_s30, %s771_s6  }
  0x23   :  { %s772_s18 = smov [#allocation7]   ;;  %s718_s23 = scalar_lea.hbm %s879_s3, 2048 }
  0x24   :  { %s44_s19 = sshll.u32 %s772_s18, 4  ;;  %p719_p2 = scmp.ne.s32.totalorder %s879_s3, %s718_s23  ;;  %s45_s19 = int_to_ptr.vmem [resolvable:$true] %s44_s19 }
  0x25   :  { %p722_p3 = scmp.lt.u32.totalorder %s718_s23, %s879_s3 }
  0x27   :  { %p724_p4 = pnand %p722_p3, %p719_p2 }
  0x29   :  { %727 = shalt.err (!%p724_p4)
}
  0x2a   :  { %s728_s28 = scalar_lea.vmem %s45_s19, 2048  ;;  %p733_p6 = scmp.lt.s32.totalorder %s45_s19, %s45_s19 }
  0x2b   :  { %p729_p5 = scmp.ne.s32.totalorder %s45_s19, %s728_s28  ;;  %p734_p7 = scmp.lt.s32.totalorder %s728_s28, %s728_s28 }
  0x2d   :  { %p735_p8 = por %p734_p7, %p733_p6 }
  0x2f   :  { %p736_p9 = pnand %p735_p8, %p729_p5 }
  0x31   :  { %739 = shalt.err (!%p736_p9)
}
  0x32   :  { %s773_s0 = smov 64   ;;  %s774_s21 = smov 4  }
  0x33   :  { %50 = dma.hbm_to_vmem [thread:$0]  %s879_s3, 2048, %s45_s19, [#allocation6], %s773_s0, %s773_s0, %s774_s21  }
  0x34   :  { %762 = dma.done.wait [#allocation3], 256  }
  0x35   :  { %763 = vsyncadd [#allocation3], 4294967040 }
  0x36   :  { %764 = dma.done.wait [#allocation6], 6144  }
  0x37   :  { %765 = vsyncadd [#allocation6], 4294961152  ;;  %v607_v0 = vld [vmem:[#allocation5 + $0x4] ss:$8 sps:$4 sm:$0xff]   ;;  %v609_v1 = vld [vmem:[#allocation5] ss:$8 sps:$4 sm:$0xff]   ;;  %v99_v50 = vlaneseq }
  0x38   :  { %279 = vmatprep.subr.bf16.mxu0 %v607_v0  ;;  %v610_v2 = vld [vmem:[#allocation5 + $0x14] ss:$8 sps:$4 sm:$0xff]   ;;  %v612_v3 = vld [vmem:[#allocation5 + $0x10] ss:$8 sps:$4 sm:$0xff]   ;;  %v613_v4 = vld [vmem:[#allocation5 + $0x24] ss:$8 sps:$4 sm:$0xff]  }
  0x39   :  { %280 = vmatpush1.bf16.msra.mxu0 %v609_v1  ;;  %v615_v5 = vld [vmem:[#allocation5 + $0x20] ss:$8 sps:$4 sm:$0xff]   ;;  %v616_v6 = vld [vmem:[#allocation5 + $0x34] ss:$8 sps:$4 sm:$0xff]   ;;  %v618_v7 = vld [vmem:[#allocation5 + $0x30] ss:$8 sps:$4 sm:$0xff]  }
  0x3a   :  { %281 = vmatprep.subr.bf16.mxu0 %v610_v2  ;;  %v619_v8 = vld [vmem:[#allocation5 + $0x44] ss:$8 sps:$4 sm:$0xff]   ;;  %v621_v9 = vld [vmem:[#allocation5 + $0x40] ss:$8 sps:$4 sm:$0xff]   ;;  %v622_v10 = vld [vmem:[#allocation5 + $0x54] ss:$8 sps:$4 sm:$0xff]  }
  0x3b   :  { %v624_v11 = vld [vmem:[#allocation5 + $0x50] ss:$8 sps:$4 sm:$0xff]   ;;  %v625_v12 = vld [vmem:[#allocation5 + $0x64] ss:$8 sps:$4 sm:$0xff]   ;;  %v627_v13 = vld [vmem:[#allocation5 + $0x60] ss:$8 sps:$4 sm:$0xff]  }
  0x3c   :  { %v628_v14 = vld [vmem:[#allocation5 + $0x74] ss:$8 sps:$4 sm:$0xff]   ;;  %v658_v16 = vld [vmem:[#allocation7 + $0x40] sm:$0xff]   ;;  %v630_v18 = vld [vmem:[#allocation5 + $0x70] ss:$8 sps:$4 sm:$0xff]   ;;  %v100_v51 = vshrl.u32 %v99_v50, 7 }
  0x3d   :  { %282 = vmatpush1.bf16.msra.mxu0 %v612_v3  ;;  %v657_v15 = vld [vmem:[#allocation2 + $0x4] ss:$8 sps:$4 sm:$0xff]   ;;  %v659_v17 = vld [vmem:[#allocation7] sm:$0xff]   ;;  %577 = vmatprep.subr.bf16.mxu1 %v658_v16  ;;  %v660_v19 = vld [vmem:[#allocation7 + $0x48] sm:$0xff]   ;;  %s775_s10 = smov [#allocation8]  }
  0x3e   :  { %283 = vmatprep.subr.bf16.mxu0 %v613_v4  ;;  %311 = vmatprep.mubr.bf16.mxu0 %v657_v15  ;;  %v661_v20 = vld [vmem:[#allocation7 + $0x8] sm:$0xff]   ;;  %v662_v21 = vld [vmem:[#allocation7 + $0x50] sm:$0xff]   ;;  %v664_v25 = vld [vmem:[#allocation7 + $0x58] sm:$0xff]   ;;  %v101_v52 = vsub.s32 0, %v100_v51  ;;  %v105_v54 = vsub.s32 1, %v100_v51  ;;  %s513_s11 = sshll.u32 %s775_s10, 4  ;;  %s514_s11 = int_to_ptr.vmem [resolvable:$true] %s513_s11 }
  0x3f   :  { %578 = vmatpush3.bf16.msra.mxu1 %v659_v17  ;;  %v631_v22 = vld [vmem:[#allocation5 + $0x84] ss:$8 sps:$4 sm:$0xff]   ;;  %v633_v23 = vld [vmem:[#allocation5 + $0x80] ss:$8 sps:$4 sm:$0xff]   ;;  %v663_v24 = vld [vmem:[#allocation7 + $0x10] sm:$0xff]   ;;  %s740_s12 = scalar_lea.vmem %s514_s11, 256  ;;  %p745_p11 = scmp.lt.s32.totalorder %s514_s11, %s514_s11 }
  0x40   :  { %579 = vmatprep.subr.bf16.mxu1 %v660_v19  ;;  %v634_v26 = vld [vmem:[#allocation5 + $0x94] ss:$8 sps:$4 sm:$0xff]   ;;  %v636_v27 = vld [vmem:[#allocation5 + $0x90] ss:$8 sps:$4 sm:$0xff]   ;;  %v666_v29 = vld [vmem:[#allocation7 + $0x60] sm:$0xff]   ;;  %p741_p10 = scmp.ne.s32.totalorder %s514_s11, %s740_s12  ;;  %p746_p12 = scmp.lt.s32.totalorder %s740_s12, %s740_s12 }
  0x41   :  { %284 = vmatpush1.bf16.msra.mxu0 %v615_v5  ;;  %v665_v28 = vld [vmem:[#allocation7 + $0x18] sm:$0xff]   ;;  %v637_v30 = vld [vmem:[#allocation5 + $0xa4] ss:$8 sps:$4 sm:$0xff]   ;;  %v639_v32 = vld [vmem:[#allocation5 + $0xa0] ss:$8 sps:$4 sm:$0xff]  }
  0x42   :  { %285 = vmatprep.subr.bf16.mxu0 %v616_v6  ;;  %v667_v31 = vld [vmem:[#allocation7 + $0x20] sm:$0xff]   ;;  %v668_v33 = vld [vmem:[#allocation7 + $0x68] sm:$0xff]   ;;  %v640_v34 = vld [vmem:[#allocation5 + $0xb4] ss:$8 sps:$4 sm:$0xff]   ;;  %p747_p13 = por %p746_p12, %p745_p11 }
  0x43   :  { %580 = vmatpush3.bf16.msra.mxu1 %v661_v20  ;;  %v642_v35 = vld [vmem:[#allocation5 + $0xb0] ss:$8 sps:$4 sm:$0xff]   ;;  %v643_v36 = vld [vmem:[#allocation5 + $0xc4] ss:$8 sps:$4 sm:$0xff]   ;;  %v645_v37 = vld [vmem:[#allocation5 + $0xc0] ss:$8 sps:$4 sm:$0xff]  }
  0x44   :  { %581 = vmatprep.subr.bf16.mxu1 %v662_v21  ;;  %v646_v38 = vld [vmem:[#allocation5 + $0xd4] ss:$8 sps:$4 sm:$0xff]   ;;  %v648_v39 = vld [vmem:[#allocation5 + $0xd0] ss:$8 sps:$4 sm:$0xff]   ;;  %v649_v40 = vld [vmem:[#allocation5 + $0xe4] ss:$8 sps:$4 sm:$0xff]   ;;  %p748_p0 = pnand %p747_p13, %p741_p10 }
  0x45   :  { %286 = vmatpush1.bf16.msra.mxu0 %v618_v7  ;;  %v651_v41 = vld [vmem:[#allocation5 + $0xe0] ss:$8 sps:$4 sm:$0xff]   ;;  %v652_v42 = vld [vmem:[#allocation5 + $0xf4] ss:$8 sps:$4 sm:$0xff]   ;;  %v654_v43 = vld [vmem:[#allocation5 + $0xf0] ss:$8 sps:$4 sm:$0xff]  }
  0x46   :  { %287 = vmatprep.subr.bf16.mxu0 %v619_v8  ;;  %v655_v44 = vld [vmem:[#allocation2] ss:$8 sps:$4 sm:$0xff]   ;;  %v669_v45 = vld [vmem:[#allocation7 + $0x28] sm:$0xff]  }
  0x47   :  { %582 = vmatpush3.bf16.msra.mxu1 %v663_v24  ;;  %v670_v46 = vld [vmem:[#allocation7 + $0x70] sm:$0xff]   ;;  %v672_v48 = vld [vmem:[#allocation7 + $0x78] sm:$0xff]  }
  0x48   :  { %583 = vmatprep.subr.bf16.mxu1 %v664_v25  ;;  %v671_v47 = vld [vmem:[#allocation7 + $0x30] sm:$0xff]   ;;  %v673_v49 = vld [vmem:[#allocation7 + $0x38] sm:$0xff]  }
  0x49   :  { %288 = vmatpush1.bf16.msra.mxu0 %v621_v9  ;;  %v97_v53 = vld [vmem:[%s878_s2] sm:$0x3] }
  0x4a   :  { %289 = vmatprep.subr.bf16.mxu0 %v622_v10  ;;  %v102_v55 = vrot.slane %v97_v53, %v101_v52  ;;  %v106_v56 = vrot.slane %v97_v53, %v105_v54  ;;  %v560_v8 = vld [vmem:[%s880_s4] ss:$0 sm:$0xff] }
  0x4b   :  { %584 = vmatpush3.bf16.msra.mxu1 %v665_v28 }
  0x4c   :  { %585 = vmatprep.subr.bf16.mxu1 %v666_v29 }
  0x4d   :  { %290 = vmatpush1.bf16.msra.mxu0 %v624_v11 }
  0x4e   :  { %291 = vmatprep.subr.bf16.mxu0 %v625_v12 }
  0x4f   :  { %586 = vmatpush3.bf16.msra.mxu1 %v667_v31 }
  0x50   :  { %587 = vmatprep.subr.bf16.mxu1 %v668_v33 }
  0x51   :  { %292 = vmatpush1.bf16.msra.mxu0 %v627_v13 }
  0x52   :  { %293 = vmatprep.subr.bf16.mxu0 %v628_v14 }
  0x53   :  { %588 = vmatpush3.bf16.msra.mxu1 %v669_v45 }
  0x54   :  { %589 = vmatprep.subr.bf16.mxu1 %v670_v46 }
  0x55   :  { %294 = vmatpush1.bf16.msra.mxu0 %v630_v18 }
  0x56   :  { %295 = vmatprep.subr.bf16.mxu0 %v631_v22 }
  0x57   :  { %590 = vmatpush3.bf16.msra.mxu1 %v671_v47 }
  0x58   :  { %591 = vmatprep.subr.bf16.mxu1 %v672_v48 }
  0x59   :  { %296 = vmatpush1.bf16.msra.mxu0 %v633_v23 }
  0x5a   :  { %297 = vmatprep.subr.bf16.mxu0 %v634_v26 }
  0x5b   :  { %592 = vmatpush3.bf16.msra.mxu1 %v673_v49 }
  0x5d   :  { %298 = vmatpush1.bf16.msra.mxu0 %v636_v27 }
  0x5e   :  { %299 = vmatprep.subr.bf16.mxu0 %v637_v30 }
  0x61   :  { %300 = vmatpush1.bf16.msra.mxu0 %v639_v32 }
  0x62   :  { %301 = vmatprep.subr.bf16.mxu0 %v640_v34 }
  0x65   :  { %302 = vmatpush1.bf16.msra.mxu0 %v642_v35 }
  0x66   :  { %303 = vmatprep.subr.bf16.mxu0 %v643_v36 }
  0x69   :  { %304 = vmatpush1.bf16.msra.mxu0 %v645_v37 }
  0x6a   :  { %305 = vmatprep.subr.bf16.mxu0 %v646_v38 }
  0x6d   :  { %306 = vmatpush1.bf16.msra.mxu0 %v648_v39 }
  0x6e   :  { %307 = vmatprep.subr.bf16.mxu0 %v649_v40 }
  0x71   :  { %308 = vmatpush1.bf16.msra.mxu0 %v651_v41 }
  0x72   :  { %309 = vmatprep.subr.bf16.mxu0 %v652_v42 }
  0x75   :  { %310 = vmatpush1.bf16.msra.mxu0 %v654_v43 }
  0x78   :  { %312 = vmatmul.mubr.bf16.vlgmr.msra.gmra.mrb[0].mxu0 %v655_v44 }
 0x14b   :  { %v313_v57 = vpop.f32.mrb[0].mxu0 }
 0x14c   :  { %v314_v58 = vadd.f32 %v313_v57, %v102_v55  ;;  %v315_v59 = vpop.f32.mrb[1].mxu0 }
 0x14d   :  { %v316_v60 = vadd.f32 %v315_v59, %v106_v56  ;;  %v317_v61 = vpop.f32.mrb[2].mxu0 }
 0x14e   :  { %v318_v62 = vadd.f32 %v317_v61, %v102_v55  ;;  %v319_v63 = vpop.f32.mrb[3].mxu0  ;;  %v322_v1 = vmax.f32 %v314_v58, 0.0 }
 0x14f   :  { %v320_v0 = vadd.f32 %v319_v63, %v106_v56  ;;  %v323_v3 = vmax.f32 %v316_v60, 0.0 }
 0x150   :  { %v324_v2 = vmax.f32 %v318_v62, 0.0 }
 0x151   :  { %v325_v4 = vmax.f32 %v320_v0, 0.0 }
 0x152   :  { %v326_v5 = vpack.c.bf16 %v324_v2, %v322_v1 }
 0x153   :  { %v327_v6 = vpack.c.bf16 %v325_v4, %v323_v3 }
 0x155   :  { %495 = vmatprep.mubr.bf16.mxu1 %v327_v6 }
 0x156   :  { %496 = vmatmul.mubr.bf16.vlgmr.msra.gmra.mrb[0].mxu1 %v326_v5 }
 0x229   :  { %v593_v7 = vpop.f32.mrb[0].mxu1 }
 0x22a   :  { %v594_v9 = vpop.f32.mrb[1].mxu1 }
 0x22b   :  { %v595_v10 = vadd.f32 %v594_v9, %v593_v7  ;;  %v596_v11 = vpop.f32.mrb[2].mxu1 }
 0x22c   :  { %v597_v12 = vpop.f32.mrb[3].mxu1 }
 0x22d   :  { %v498_v13 = vadd.f32 %v595_v10, %v560_v8  ;;  %v598_v14 = vadd.f32 %v597_v12, %v596_v11 }
 0x22f   :  { %v504_v15 = vmax.f32 %v498_v13, 0.0  ;;  %v501_v16 = vadd.f32 %v598_v14, %v560_v8 }
 0x231   :  { %506 = vst [vmem:[#allocation8] sm:$0xff] %v504_v15  ;;  %v505_v17 = vmax.f32 %v501_v16, 0.0 }
 0x233   :  { %507 = vst [vmem:[#allocation8 + $0x8] sm:$0xff] %v505_v17 }
 0x234   :  { %751 = shalt.err (!%p748_p0)
}
 0x235   :  { %s752_s14 = scalar_lea.hbm %s881_s5, 256 }
 0x236   :  { %p753_p1 = scmp.ne.s32.totalorder %s881_s5, %s752_s14  ;;  %p756_p2 = scmp.lt.u32.totalorder %s752_s14, %s881_s5 }
 0x238   :  { %p758_p3 = pnand %p756_p2, %p753_p1 }
 0x23a   :  { %761 = shalt.err (!%p758_p3)
}
 0x23b   :  { %519 = dma.vmem_to_hbm [thread:$0]  %s514_s11, 256, %s881_s5, [#allocation4], %s770_s30, %s770_s30, %s771_s6  }
 0x23c   :  { %766 = dma.done.wait [#allocation4], 256  }
 0x23d   :  { %767 = vsyncadd [#allocation4], 4294967040 }
 0x23e   :  { %523 = vsyncpa [#allocation3], 1 }
 0x23f   :  { %524 = vsyncpa [#allocation6], 1 }
 0x240   :  { %525 = vsyncpa [#allocation4], 1 }

</bundles_post_ra>
